<compile_context>
chip_gen: v6e
topology: v6e:2x2x1
jax: 0.10.0
libtpu: 0.0.40
codegen_flags: <defaults>
</compile_context>

<pallas_src>
import functools

import jax
import jax.numpy as jnp
from jax.experimental import pallas as pl
from jax.experimental.pallas import tpu as pltpu

NUM_VIEWS = 4


def _round_up(x, m):
    return ((x + m - 1) // m) * m


def _shared_special_loss_kernel(shared_ref, specific_ref, out_ref, acc_ref, *,
                                tm, valid_rows, needs_mask):
    a = shared_ref[...].astype(jnp.float32)
    b = specific_ref[...].astype(jnp.float32)

    # F.normalize(x, dim=1) == x / max(||x||, eps) == x * rsqrt(max(||x||^2, eps^2))
    eps2 = 1e-24
    a = a * jax.lax.rsqrt(jnp.maximum(jnp.sum(a * a, axis=1, keepdims=True), eps2))
    b = b * jax.lax.rsqrt(jnp.maximum(jnp.sum(b * b, axis=1, keepdims=True), eps2))

    row = jax.lax.broadcasted_iota(jnp.int32, (tm, 1), 0)   # (tm, 1) i32
    mod4 = row % NUM_VIEWS

    if needs_mask:
        # Rows at/after valid_rows (trailing rows with no full chunk, or block
        # padding past the end of the array) must not contribute.
        valid = (pl.program_id(0) * tm + row) < valid_rows  # (tm, 1) bool

    # Block-diagonal similarities only.  For shift s, row i pairs with row
    # 4*(i//4) + (i%4 + s) % 4 of b.  That partner row is roll(b, tm - s)
    # (i.e. b[i + s]) where the group does not wrap, and roll(b, 4 - s)
    # (i.e. b[i + s - 4]) where it does.
    tile_loss = jnp.zeros((tm, 1), jnp.float32)
    for s in range(NUM_VIEWS):
        if s == 0:
            b_s = b
        else:
            fwd = pltpu.roll(b, tm - s, axis=0)            # b_s[i] = b[i + s]
            back = pltpu.roll(b, NUM_VIEWS - s, axis=0)    # b_s[i] = b[i + s - 4]
            b_s = jnp.where(mod4 < NUM_VIEWS - s, fwd, back)
        sim = jnp.sum(a * b_s, axis=1, keepdims=True)      # (tm, 1) cosine sims
        sim = jnp.clip(sim, 0.0005, 0.9995)
        if needs_mask:
            # Zero invalid rows AFTER the clip: log(1 - 0) == 0, so padded /
            # garbage rows (possibly NaN) contribute nothing.
            sim = jnp.where(valid, sim, 0.0)
        tile_loss = tile_loss - jnp.log(1.0 - sim)

    @pl.when(pl.program_id(0) == 0)
    def _():
        acc_ref[...] = jnp.zeros_like(acc_ref)

    acc_ref[...] += tile_loss

    # Each chunk contributes mean over its 4x4 block = sum / 16; chunks sum.
    @pl.when(pl.program_id(0) == pl.num_programs(0) - 1)
    def _():
        out_ref[0, 0] = jnp.sum(acc_ref[...]) * (1.0 / float(NUM_VIEWS * NUM_VIEWS))


def shared_special_loss(shared_features, specific_features, *, block_rows=None):
    """Pallas TPU implementation of SharedSpecialLoss.forward."""
    assert shared_features.ndim == 2 and specific_features.ndim == 2
    assert shared_features.shape == specific_features.shape
    B, D = shared_features.shape

    num_chunks = B // NUM_VIEWS
    if num_chunks == 0:
        return jnp.float32(0.0)
    valid_rows = num_chunks * NUM_VIEWS

    itemsize = jnp.dtype(shared_features.dtype).itemsize

    # Row-tile size: multiple of 8 (f32 sublanes) and of NUM_VIEWS so chunks
    # never straddle a tile; capped so the double-buffered input tiles plus the
    # in-kernel f32 temporaries comfortably fit the smallest per-core VMEM
    # (v7x: 64 MiB physical; v5e: 16 MiB default scoped limit -- raised below).
    per_tile_input_budget = 2 * 1024 * 1024                 # bytes per input tile
    mem_rows = max(8, per_tile_input_budget // max(D * itemsize, 1))
    tm = min(512, mem_rows, _round_up(valid_rows, 8))
    if block_rows is not None:
        tm = min(tm, block_rows)
    tm = max(8, (tm // 8) * 8)

    num_tiles = pl.cdiv(valid_rows, tm)
    needs_mask = (valid_rows % tm) != 0

    kernel = functools.partial(
        _shared_special_loss_kernel, tm=tm, valid_rows=valid_rows,
        needs_mask=needs_mask)

    cost = pl.CostEstimate(
        flops=num_tiles * 16 * tm * D,
        transcendentals=num_tiles * 6 * tm,
        bytes_accessed=2 * num_tiles * tm * D * itemsize + 4,
    )

    # TODO(synk): v7x two-TensorCore variant -- mark the row-tile axis
    # "parallel" and emit per-tile partials through a blocked out_spec, summing
    # in the wrapper; kept the sequential single-scalar accumulator here for
    # portability across v5e / v6e / v7x.
    out = pl.pallas_call(
        kernel,
        out_shape=jax.ShapeDtypeStruct((1, 1), jnp.float32),
        grid=(num_tiles,),
        in_specs=[
            pl.BlockSpec((tm, D), lambda i: (i, 0)),
            pl.BlockSpec((tm, D), lambda i: (i, 0)),
        ],
        # Single scalar result stays resident in SMEM for the whole grid; it is
        # written exactly once, on the last grid step.
        out_specs=pl.BlockSpec(memory_space=pltpu.MemorySpace.SMEM),
        scratch_shapes=[pltpu.VMEM((tm, 1), jnp.float32)],
        compiler_params=pltpu.CompilerParams(
            dimension_semantics=("arbitrary",),
            vmem_limit_bytes=48 * 1024 * 1024,
        ),
        cost_estimate=cost,
    )(shared_features, specific_features)

    return out[0, 0]


def _reference(shared, specific):
    # Pure-JAX reference mirroring the PyTorch loop.
    B = shared.shape[0]
    num_chunks = B // NUM_VIEWS
    total = jnp.float32(0.0)
    for i in range(num_chunks):
        a = shared[NUM_VIEWS * i:NUM_VIEWS * (i + 1)]
        b = specific[NUM_VIEWS * i:NUM_VIEWS * (i + 1)]
        a = a / jnp.maximum(jnp.linalg.norm(a, axis=1, keepdims=True), 1e-12)
        b = b / jnp.maximum(jnp.linalg.norm(b, axis=1, keepdims=True), 1e-12)
        sim = jnp.clip(a @ b.T, 0.0005, 0.9995)
        total += jnp.mean(-jnp.log(1.0 - sim))
    return total


if __name__ == "__main__":
    key = jax.random.PRNGKey(0)
    k1, k2, k3, k4, k5, k6 = jax.random.split(key, 6)

    # Case 1: 2 chunks of num_views=4, single row tile, no mask.
    s1 = jax.random.normal(k1, (8, 32), dtype=jnp.float32)
    p1 = jax.random.normal(k2, (8, 32), dtype=jnp.float32)
    out1 = shared_special_loss(s1, p1)
    jax.block_until_ready(out1)
    ref1 = _reference(s1, p1)
    assert jnp.allclose(out1, ref1, rtol=1e-4, atol=1e-4), (out1, ref1)

    # Case 2: 4 chunks over a 2-step grid (exercises cross-tile accumulation).
    s2 = jax.random.normal(k3, (16, 128), dtype=jnp.float32)
    p2 = jax.random.normal(k4, (16, 128), dtype=jnp.float32)
    out2 = shared_special_loss(s2, p2, block_rows=8)
    jax.block_until_ready(out2)
    ref2 = _reference(s2, p2)
    assert jnp.allclose(out2, ref2, rtol=1e-4, atol=1e-4), (out2, ref2)

    # Case 3: batch (14) not a multiple of the tile: last tile has 4 valid
    # rows, 2 real-but-unchunked rows and 2 out-of-bounds padded rows --
    # exercises the row-validity mask path.
    s3 = jax.random.normal(k5, (14, 64), dtype=jnp.float32)
    p3 = jax.random.normal(k6, (14, 64), dtype=jnp.float32)
    out3 = shared_special_loss(s3, p3, block_rows=8)
    jax.block_until_ready(out3)
    ref3 = _reference(s3, p3)
    assert jnp.allclose(out3, ref3, rtol=1e-4, atol=1e-4), (out3, ref3)

    print("KERNEL_OK")
</pallas_src>

<mosaic_0001>
module attributes {stable_mosaic.version = 11 : i64} {
  func.func @_shared_special_loss_kernel(%arg0: i32, %arg1: memref<8x32xf32, #tpu.memory_space<vmem>>, %arg2: memref<8x32xf32, #tpu.memory_space<vmem>>, %arg3: memref<1x1xf32, #tpu.memory_space<smem>>, %arg4: memref<8x1xf32, #tpu.memory_space<vmem>>) attributes {dimension_semantics = [#tpu.dimension_semantics<arbitrary>], iteration_bounds = array<i64: 1>, scalar_prefetch = 0 : i64, scratch_operands = 1 : i64, tpu.core_type = #tpu.core_type<tc>, window_params = [{transform_indices = @transform_0, window_bounds = array<i64: 8, 32>}, {transform_indices = @transform_1, window_bounds = array<i64: 8, 32>}, {transform_indices = @transform_2, window_bounds = array<i64: 1, 1>}]} {
    %c0 = arith.constant 0 : index
    %c0_0 = arith.constant 0 : index
    %0 = vector.load %arg1[%c0, %c0_0] : memref<8x32xf32, #tpu.memory_space<vmem>>, vector<8x32xf32>
    %c0_1 = arith.constant 0 : index
    %c0_2 = arith.constant 0 : index
    %1 = vector.load %arg2[%c0_1, %c0_2] : memref<8x32xf32, #tpu.memory_space<vmem>>, vector<8x32xf32>
    %2 = arith.mulf %0, %0 : vector<8x32xf32>
    %cst = arith.constant dense<0.000000e+00> : vector<8xf32>
    %3 = vector.multi_reduction <add>, %2, %cst [1] : vector<8x32xf32> to vector<8xf32>
    %4 = vector.shape_cast %3 : vector<8xf32> to vector<8x1xf32>
    %cst_3 = arith.constant 1.000000e-24 : f32
    %5 = vector.broadcast %cst_3 : f32 to vector<8x1xf32>
    %6 = arith.maximumf %4, %5 : vector<8x1xf32>
    %7 = math.rsqrt %6 : vector<8x1xf32>
    %8 = vector.broadcast %7 : vector<8x1xf32> to vector<8x32xf32>
    %9 = arith.mulf %0, %8 : vector<8x32xf32>
    %10 = arith.mulf %1, %1 : vector<8x32xf32>
    %cst_4 = arith.constant dense<0.000000e+00> : vector<8xf32>
    %11 = vector.multi_reduction <add>, %10, %cst_4 [1] : vector<8x32xf32> to vector<8xf32>
    %12 = vector.shape_cast %11 : vector<8xf32> to vector<8x1xf32>
    %cst_5 = arith.constant 1.000000e-24 : f32
    %13 = vector.broadcast %cst_5 : f32 to vector<8x1xf32>
    %14 = arith.maximumf %12, %13 : vector<8x1xf32>
    %15 = math.rsqrt %14 : vector<8x1xf32>
    %16 = vector.broadcast %15 : vector<8x1xf32> to vector<8x32xf32>
    %17 = arith.mulf %1, %16 : vector<8x32xf32>
    %18 = tpu.iota {dimensions = array<i32: 0>} : vector<8x1xi32>
    %c4_i32 = arith.constant 4 : i32
    %c0_i32 = arith.constant 0 : i32
    %19 = arith.cmpi eq, %c4_i32, %c0_i32 : i32
    %c1_i32 = arith.constant 1 : i32
    %20 = arith.select %19, %c1_i32, %c4_i32 : i32
    %21 = vector.broadcast %20 : i32 to vector<8x1xi32>
    %22 = arith.remsi %18, %21 : vector<8x1xi32>
    %c0_i32_6 = arith.constant 0 : i32
    %23 = vector.broadcast %c0_i32_6 : i32 to vector<8x1xi32>
    %24 = arith.cmpi ne, %22, %23 : vector<8x1xi32>
    %c0_i32_7 = arith.constant 0 : i32
    %25 = vector.broadcast %c0_i32_7 : i32 to vector<8x1xi32>
    %26 = arith.cmpi slt, %22, %25 : vector<8x1xi32>
    %c0_i32_8 = arith.constant 0 : i32
    %27 = arith.cmpi slt, %20, %c0_i32_8 : i32
    %28 = vector.broadcast %27 : i1 to vector<8x1xi1>
    %29 = vector.broadcast %28 : vector<8x1xi1> to vector<8x1xi1>
    %30 = arith.xori %26, %29 : vector<8x1xi1>
    %31 = arith.andi %30, %24 : vector<8x1xi1>
    %32 = vector.broadcast %20 : i32 to vector<8x1xi32>
    %33 = arith.addi %22, %32 : vector<8x1xi32>
    %34 = arith.select %31, %33, %22 : vector<8x1xi1>, vector<8x1xi32>
    %cst_9 = arith.constant 0.000000e+00 : f32
    %35 = vector.broadcast %cst_9 : f32 to vector<8x1xf32>
    %36 = arith.mulf %9, %17 : vector<8x32xf32>
    %cst_10 = arith.constant dense<0.000000e+00> : vector<8xf32>
    %37 = vector.multi_reduction <add>, %36, %cst_10 [1] : vector<8x32xf32> to vector<8xf32>
    %38 = vector.shape_cast %37 : vector<8xf32> to vector<8x1xf32>
    %cst_11 = arith.constant 5.000000e-04 : f32
    %cst_12 = arith.constant 0.999499976 : f32
    %39 = vector.broadcast %cst_11 : f32 to vector<8x1xf32>
    %40 = arith.maximumf %39, %38 : vector<8x1xf32>
    %41 = vector.broadcast %cst_12 : f32 to vector<8x1xf32>
    %42 = arith.minimumf %41, %40 : vector<8x1xf32>
    %cst_13 = arith.constant 1.000000e+00 : f32
    %43 = vector.broadcast %cst_13 : f32 to vector<8x1xf32>
    %44 = arith.subf %43, %42 : vector<8x1xf32>
    %45 = math.log %44 : vector<8x1xf32>
    %46 = arith.subf %35, %45 : vector<8x1xf32>
    %c7_i32 = arith.constant 7 : i32
    %47 = tpu.dynamic_rotate %17 by %c7_i32 dim 0 : vector<8x32xf32>, i32 -> vector<8x32xf32>
    %c3_i32 = arith.constant 3 : i32
    %48 = tpu.dynamic_rotate %17 by %c3_i32 dim 0 : vector<8x32xf32>, i32 -> vector<8x32xf32>
    %c3_i32_14 = arith.constant 3 : i32
    %49 = vector.broadcast %c3_i32_14 : i32 to vector<8x1xi32>
    %50 = arith.cmpi slt, %34, %49 : vector<8x1xi32>
    %51 = vector.shape_cast %50 : vector<8x1xi1> to vector<8x1xi1>
    %52 = vector.broadcast %51 : vector<8x1xi1> to vector<8x32xi1>
    %53 = arith.select %52, %47, %48 : vector<8x32xi1>, vector<8x32xf32>
    %54 = arith.mulf %9, %53 : vector<8x32xf32>
    %cst_15 = arith.constant dense<0.000000e+00> : vector<8xf32>
    %55 = vector.multi_reduction <add>, %54, %cst_15 [1] : vector<8x32xf32> to vector<8xf32>
    %56 = vector.shape_cast %55 : vector<8xf32> to vector<8x1xf32>
    %cst_16 = arith.constant 5.000000e-04 : f32
    %cst_17 = arith.constant 0.999499976 : f32
    %57 = vector.broadcast %cst_16 : f32 to vector<8x1xf32>
    %58 = arith.maximumf %57, %56 : vector<8x1xf32>
    %59 = vector.broadcast %cst_17 : f32 to vector<8x1xf32>
    %60 = arith.minimumf %59, %58 : vector<8x1xf32>
    %cst_18 = arith.constant 1.000000e+00 : f32
    %61 = vector.broadcast %cst_18 : f32 to vector<8x1xf32>
    %62 = arith.subf %61, %60 : vector<8x1xf32>
    %63 = math.log %62 : vector<8x1xf32>
    %64 = arith.subf %46, %63 : vector<8x1xf32>
    %c6_i32 = arith.constant 6 : i32
    %65 = tpu.dynamic_rotate %17 by %c6_i32 dim 0 : vector<8x32xf32>, i32 -> vector<8x32xf32>
    %c2_i32 = arith.constant 2 : i32
    %66 = tpu.dynamic_rotate %17 by %c2_i32 dim 0 : vector<8x32xf32>, i32 -> vector<8x32xf32>
    %c2_i32_19 = arith.constant 2 : i32
    %67 = vector.broadcast %c2_i32_19 : i32 to vector<8x1xi32>
    %68 = arith.cmpi slt, %34, %67 : vector<8x1xi32>
    %69 = vector.shape_cast %68 : vector<8x1xi1> to vector<8x1xi1>
    %70 = vector.broadcast %69 : vector<8x1xi1> to vector<8x32xi1>
    %71 = arith.select %70, %65, %66 : vector<8x32xi1>, vector<8x32xf32>
    %72 = arith.mulf %9, %71 : vector<8x32xf32>
    %cst_20 = arith.constant dense<0.000000e+00> : vector<8xf32>
    %73 = vector.multi_reduction <add>, %72, %cst_20 [1] : vector<8x32xf32> to vector<8xf32>
    %74 = vector.shape_cast %73 : vector<8xf32> to vector<8x1xf32>
    %cst_21 = arith.constant 5.000000e-04 : f32
    %cst_22 = arith.constant 0.999499976 : f32
    %75 = vector.broadcast %cst_21 : f32 to vector<8x1xf32>
    %76 = arith.maximumf %75, %74 : vector<8x1xf32>
    %77 = vector.broadcast %cst_22 : f32 to vector<8x1xf32>
    %78 = arith.minimumf %77, %76 : vector<8x1xf32>
    %cst_23 = arith.constant 1.000000e+00 : f32
    %79 = vector.broadcast %cst_23 : f32 to vector<8x1xf32>
    %80 = arith.subf %79, %78 : vector<8x1xf32>
    %81 = math.log %80 : vector<8x1xf32>
    %82 = arith.subf %64, %81 : vector<8x1xf32>
    %c5_i32 = arith.constant 5 : i32
    %83 = tpu.dynamic_rotate %17 by %c5_i32 dim 0 : vector<8x32xf32>, i32 -> vector<8x32xf32>
    %c1_i32_24 = arith.constant 1 : i32
    %84 = tpu.dynamic_rotate %17 by %c1_i32_24 dim 0 : vector<8x32xf32>, i32 -> vector<8x32xf32>
    %c1_i32_25 = arith.constant 1 : i32
    %85 = vector.broadcast %c1_i32_25 : i32 to vector<8x1xi32>
    %86 = arith.cmpi slt, %34, %85 : vector<8x1xi32>
    %87 = vector.shape_cast %86 : vector<8x1xi1> to vector<8x1xi1>
    %88 = vector.broadcast %87 : vector<8x1xi1> to vector<8x32xi1>
    %89 = arith.select %88, %83, %84 : vector<8x32xi1>, vector<8x32xf32>
    %90 = arith.mulf %9, %89 : vector<8x32xf32>
    %cst_26 = arith.constant dense<0.000000e+00> : vector<8xf32>
    %91 = vector.multi_reduction <add>, %90, %cst_26 [1] : vector<8x32xf32> to vector<8xf32>
    %92 = vector.shape_cast %91 : vector<8xf32> to vector<8x1xf32>
    %cst_27 = arith.constant 5.000000e-04 : f32
    %cst_28 = arith.constant 0.999499976 : f32
    %93 = vector.broadcast %cst_27 : f32 to vector<8x1xf32>
    %94 = arith.maximumf %93, %92 : vector<8x1xf32>
    %95 = vector.broadcast %cst_28 : f32 to vector<8x1xf32>
    %96 = arith.minimumf %95, %94 : vector<8x1xf32>
    %cst_29 = arith.constant 1.000000e+00 : f32
    %97 = vector.broadcast %cst_29 : f32 to vector<8x1xf32>
    %98 = arith.subf %97, %96 : vector<8x1xf32>
    %99 = math.log %98 : vector<8x1xf32>
    %100 = arith.subf %82, %99 : vector<8x1xf32>
    %c0_i32_30 = arith.constant 0 : i32
    %101 = arith.cmpi eq, %arg0, %c0_i32_30 : i32
    %102 = arith.extui %101 : i1 to i32
    %c0_i32_31 = arith.constant 0 : i32
    %103 = arith.cmpi ne, %102, %c0_i32_31 : i32
    scf.if %103 {
      %cst_38 = arith.constant 0.000000e+00 : f32
      %110 = vector.broadcast %cst_38 : f32 to vector<8x1xf32>
      %c0_39 = arith.constant 0 : index
      %c0_40 = arith.constant 0 : index
      %111 = vector.load %arg4[%c0_39, %c0_40] : memref<8x1xf32, #tpu.memory_space<vmem>>, vector<8x1xf32>
      tpu.vector_store %arg4[%c0_39, %c0_40], %110 {strides = array<i32>} : memref<8x1xf32, #tpu.memory_space<vmem>>, vector<8x1xf32>,
    } else {
    }
    %c0_32 = arith.constant 0 : index
    %c0_33 = arith.constant 0 : index
    %104 = vector.load %arg4[%c0_32, %c0_33] : memref<8x1xf32, #tpu.memory_space<vmem>>, vector<8x1xf32>
    %105 = arith.addf %104, %100 : vector<8x1xf32>
    %c0_34 = arith.constant 0 : index
    %c0_35 = arith.constant 0 : index
    %106 = vector.load %arg4[%c0_34, %c0_35] : memref<8x1xf32, #tpu.memory_space<vmem>>, vector<8x1xf32>
    tpu.vector_store %arg4[%c0_34, %c0_35], %105 {strides = array<i32>} : memref<8x1xf32, #tpu.memory_space<vmem>>, vector<8x1xf32>,
    %c0_i32_36 = arith.constant 0 : i32
    %107 = arith.cmpi eq, %arg0, %c0_i32_36 : i32
    %108 = arith.extui %107 : i1 to i32
    %c0_i32_37 = arith.constant 0 : i32
    %109 = arith.cmpi ne, %108, %c0_i32_37 : i32
    scf.if %109 {
      %c0_38 = arith.constant 0 : index
      %c0_39 = arith.constant 0 : index
      %110 = vector.load %arg4[%c0_38, %c0_39] : memref<8x1xf32, #tpu.memory_space<vmem>>, vector<8x1xf32>
      %111 = vector.shape_cast %110 : vector<8x1xf32> to vector<1x8x1xf32>
      %cst_40 = arith.constant dense<0.000000e+00> : vector<1xf32>
      %112 = vector.multi_reduction <add>, %111, %cst_40 [1, 2] : vector<1x8x1xf32> to vector<1xf32>
      %113 = vector.shape_cast %112 : vector<1xf32> to vector<1x1x1xf32>
      %114 = vector.extract %113[0, 0, 0] : f32 from vector<1x1x1xf32>
      %cst_41 = arith.constant 6.250000e-02 : f32
      %115 = arith.mulf %114, %cst_41 : f32
      %c0_42 = arith.constant 0 : index
      %c0_43 = arith.constant 0 : index
      %116 = memref.load %arg3[%c0_42, %c0_43] : memref<1x1xf32, #tpu.memory_space<smem>>
      memref.store %115, %arg3[%c0_42, %c0_43] : memref<1x1xf32, #tpu.memory_space<smem>>
    } else {
    }
    return
  }
  func.func @transform_0(%arg0: i32) -> (i32, i32) {
    %c0_i32 = arith.constant 0 : i32
    %c0_i32_0 = arith.constant 0 : i32
    return %arg0, %c0_i32 : i32, i32
  }
  func.func @transform_1(%arg0: i32) -> (i32, i32) {
    %c0_i32 = arith.constant 0 : i32
    %c0_i32_0 = arith.constant 0 : i32
    return %arg0, %c0_i32 : i32, i32
  }
  func.func @transform_2(%arg0: i32) -> (i32, i32) {
    %c0_i32 = arith.constant 0 : i32
    %c0_i32_0 = arith.constant 0 : i32
    %c0_i32_1 = arith.constant 0 : i32
    return %c0_i32, %c0_i32_0 : i32, i32
  }
}

</mosaic_0001>

<bundles_post_ra>
// kernel: tpu_custom_call.1
= control target key start
LH: loop header
LB: loop body
LE: loop exit
PB: predicated region body
PF: predicated region fallthrough
CT: control target
= control target key end

     0   :  { %7 = vsyncpa [#allocation4], 0  ;;  %s276_s0 = inlined_call_operand.hbm [shape: f32[8,32], index: 0, kind: input, shape index: {}]   ;;  %s277_s1 = inlined_call_operand.hbm [shape: f32[8,32], index: 1, kind: input, shape index: {}]   ;;  %s278_s2 = inlined_call_operand.hbm [shape: f32[1,1], index: 2, kind: output, shape index: {}]  }
   0x1   :  { %8 = vsyncpa [#allocation7], 0 }
   0x2   :  { %9 = vsyncpa [#allocation5], 0  ;;  %s239_s9 = smov [#allocation3]   ;;  %s240_s11 = smov [#allocation6]  }
   0x3   :  { %s16_s10 = sshll.u32 %s239_s9, 4  ;;  %s26_s12 = sshll.u32 %s240_s11, 4  ;;  %s17_s10 = int_to_ptr.vmem [resolvable:$true] %s16_s10  ;;  %s27_s12 = int_to_ptr.vmem [resolvable:$true] %s26_s12 }
   0x4   :  { %s193_s13 = scalar_lea.vmem %s17_s10, 128  ;;  %p198_p1 = scmp.lt.s32.totalorder %s17_s10, %s17_s10 }
   0x5   :  { %p194_p0 = scmp.ne.s32.totalorder %s17_s10, %s193_s13  ;;  %p199_p2 = scmp.lt.s32.totalorder %s193_s13, %s193_s13 }
   0x7   :  { %p200_p3 = por %p199_p2, %p198_p1 }
   0x9   :  { %p201_p4 = pnand %p200_p3, %p194_p0 }
   0xb   :  { %204 = shalt.err (!%p201_p4)
}
   0xc   :  { %19 = dma.hbm_to_vmem [thread:$0]  %s276_s0, 128, %s17_s10, [#allocation4]  }
   0xd   :  { %s213_s16 = scalar_lea.vmem %s27_s12, 128  ;;  %p218_p6 = scmp.lt.s32.totalorder %s27_s12, %s27_s12 }
   0xe   :  { %p214_p5 = scmp.ne.s32.totalorder %s27_s12, %s213_s16  ;;  %p219_p7 = scmp.lt.s32.totalorder %s213_s16, %s213_s16 }
  0x10   :  { %p220_p8 = por %p219_p7, %p218_p6 }
  0x12   :  { %p221_p9 = pnand %p220_p8, %p214_p5 }
  0x14   :  { %224 = shalt.err (!%p221_p9)
}
  0x15   :  { %29 = dma.hbm_to_vmem [thread:$0]  %s277_s1, 128, %s27_s12, [#allocation7]  }
  0x16   :  { %233 = dma.done.wait [#allocation4], 128  }
  0x17   :  { %234 = vsyncadd [#allocation4], 4294967168 }
  0x18   :  { %235 = dma.done.wait [#allocation7], 128  }
  0x19   :  { %236 = vsyncadd [#allocation7], 4294967168  ;;  %v37_v0 = vld [vmem:[#allocation6] sm:$0xff]  ;;  %vm39_vm0 = vcmask 261120   ;;  %v36_v1 = vld [vmem:[#allocation3] sm:$0xff]  ;;  %v53_v10 = vlaneseq  ;;  %vm129_vm4 = vcmask 7168  }
  0x1a   :  { %v46_v2 = vmul.f32 %v37_v0, %v37_v0  ;;  %v38_v3 = vmul.f32 %v36_v1, %v36_v1  ;;  %v241_v34 = vmov 0.0   ;;  %s242_s19 = smov [#allocation8]  }
  0x1b   :  { %v54_v11 = vshrl.u32 %v53_v10, 7  ;;  %130 = vst.msk [vmem:[#allocation2] sm:$0xff] %vm129_vm4, %v241_v34 }
  0x1c   :  { %v47_v4 = vsel %vm39_vm0, %v46_v2, 0.0  ;;  %v40_v5 = vsel %vm39_vm0, %v38_v3, 0.0 }
  0x1d   :  { %48 = vadd.xlane.f32.xlu0 %v47_v4  ;;  %v59_v12 = vand.u32 3, %v54_v11 }
  0x1f   :  { %vm95_vm1 = vcmp.lt.s32.totalorder %v59_v12, 2  ;;  %vm79_vm2 = vcmp.lt.s32.totalorder %v59_v12, 3  ;;  %vm111_vm3 = vcmp.lt.s32.totalorder %v59_v12, 1 }
  0x21   :  { %41 = vadd.xlane.f32.xlu0 %v40_v5 }
  0x22   :  { %v131_v62 = vld [vmem:[#allocation2] sm:$0xff] }
  0xa6   :  { %v49_v6 = vpop.xlane.xlu0 %48 }
  0xa7   :  { %v50_v7 = vmax.f32 %v49_v6, 1e-24 }
  0xa9   :  { %173 = vrsqrt.f32 %v50_v7 }
  0xaa   :  { %v42_v8 = vpop.xlane.xlu0 %41 }
  0xab   :  { %v43_v9 = vmax.f32 %v42_v8, 1e-24 }
  0xad   :  { %175 = vrsqrt.f32 %v43_v9 }
  0xb6   :  { %v174_v13 = vpop.eup %173 }
  0xb7   :  { %v52_v14 = vmul.f32 %v174_v13, %v37_v0 }
  0xb9   :  { %v93_v15 = vrot.slane %v52_v14, 2  ;;  %v94_v16 = vrot.slane %v52_v14, 6  ;;  %v77_v17 = vrot.slane %v52_v14, 1  ;;  %v78_v18 = vrot.slane %v52_v14, 5 }
  0xba   :  { %v176_v19 = vpop.eup %175  ;;  %v109_v23 = vrot.slane %v52_v14, 3  ;;  %v110_v24 = vrot.slane %v52_v14, 7 }
  0xbb   :  { %v45_v20 = vmul.f32 %v176_v19, %v36_v1  ;;  %v98_v21 = vsel %vm95_vm1, %v93_v15, %v94_v16  ;;  %v82_v22 = vsel %vm79_vm2, %v77_v17, %v78_v18 }
  0xbc   :  { %v114_v30 = vsel %vm111_vm3, %v109_v23, %v110_v24 }
  0xbd   :  { %v99_v25 = vmul.f32 %v98_v21, %v45_v20  ;;  %v67_v26 = vmul.f32 %v52_v14, %v45_v20  ;;  %v83_v29 = vmul.f32 %v82_v22, %v45_v20  ;;  %v115_v32 = vmul.f32 %v114_v30, %v45_v20 }
  0xbf   :  { %v100_v27 = vsel %vm39_vm0, %v99_v25, 0.0  ;;  %v68_v28 = vsel %vm39_vm0, %v67_v26, 0.0  ;;  %v84_v31 = vsel %vm39_vm0, %v83_v29, 0.0  ;;  %v116_v33 = vsel %vm39_vm0, %v115_v32, 0.0 }
  0xc0   :  { %101 = vadd.xlane.f32.xlu0 %v100_v27  ;;  %69 = vadd.xlane.f32.xlu1 %v68_v28 }
  0xc4   :  { %85 = vadd.xlane.f32.xlu1 %v84_v31 }
  0xc8   :  { %117 = vadd.xlane.f32.xlu1 %v116_v33 }
 0x149   :  { %v102_v35 = vpop.xlane.xlu0 %101  ;;  %v70_v36 = vpop.xlane.xlu1 %69 }
 0x14a   :  { %v103_v37 = vmax.f32 %v102_v35, 0.0005  ;;  %v71_v38 = vmax.f32 %v70_v36, 0.0005 }
 0x14c   :  { %v104_v39 = vmin.f32 %v103_v37, 0.9995  ;;  %v72_v40 = vmin.f32 %v71_v38, 0.9995 }
 0x14d   :  { %v86_v41 = vpop.xlane.xlu1 %85 }
 0x14e   :  { %v73_v42 = vsub.f32 1.0, %v72_v40  ;;  %v87_v43 = vmax.f32 %v86_v41, 0.0005  ;;  %v105_v44 = vsub.f32 1.0, %v104_v39 }
 0x150   :  { %v88_v45 = vmin.f32 %v87_v43, 0.9995  ;;  %177 = vlog2.f32 %v73_v42 }
 0x151   :  { %v118_v46 = vpop.xlane.xlu1 %117  ;;  %179 = vlog2.f32 %v105_v44 }
 0x152   :  { %v89_v47 = vsub.f32 1.0, %v88_v45  ;;  %v119_v48 = vmax.f32 %v118_v46, 0.0005 }
 0x154   :  { %181 = vlog2.f32 %v89_v47  ;;  %v120_v49 = vmin.f32 %v119_v48, 0.9995 }
 0x156   :  { %v121_v50 = vsub.f32 1.0, %v120_v49 }
 0x158   :  { %183 = vlog2.f32 %v121_v50 }
 0x15d   :  { %v178_v51 = vpop.eup %177 }
 0x15e   :  { %v75_v52 = vmul.f32 0.6931472, %v178_v51  ;;  %v180_v53 = vpop.eup %179 }
 0x15f   :  { %v107_v57 = vmul.f32 0.6931472, %v180_v53 }
 0x160   :  { %v76_v55 = vsub.f32 0.0, %v75_v52 }
 0x161   :  { %v182_v54 = vpop.eup %181 }
 0x162   :  { %v91_v56 = vmul.f32 0.6931472, %v182_v54 }
 0x164   :  { %v92_v58 = vsub.f32 %v76_v55, %v91_v56 }
 0x165   :  { %v184_v59 = vpop.eup %183 }
 0x166   :  { %v108_v60 = vsub.f32 %v92_v58, %v107_v57  ;;  %v123_v61 = vmul.f32 0.6931472, %v184_v59 }
 0x168   :  { %v124_v63 = vsub.f32 %v108_v60, %v123_v61 }
 0x16a   :  { %v132_v0 = vadd.f32 %v131_v62, %v124_v63 }
 0x16c   :  { %134 = vst.msk [vmem:[#allocation2] sm:$0xff] %vm129_vm4, %v132_v0 }
 0x173   :  { %v138_v1 = vld [vmem:[#allocation2] sm:$0xff] }
 0x174   :  { %v139_v2 = vsel %vm129_vm4, %v138_v1, 0.0 }
 0x175   :  { %140 = vadd.xlane.f32.xlu0 %v139_v2 }
 0x1fe   :  { %v141_v3 = vpop.xlane.xlu0 %140 }
 0x1ff   :  { %v142_v4 = vrot.slane %v141_v3, 4 }
 0x201   :  { %v143_v5 = vadd.f32 %v142_v4, %v141_v3 }
 0x203   :  { %v144_v6 = vrot.slane %v143_v5, 2 }
 0x205   :  { %v145_v7 = vadd.f32 %v144_v6, %v143_v5 }
 0x207   :  { %v146_v8 = vrot.slane %v145_v7, 1 }
 0x209   :  { %v147_v9 = vadd.f32 %v146_v8, %v145_v7 }
 0x20b   :  { %167 = vpush %v147_v9 }
 0x23c   :  { %s168_s0 = spop %167 }
 0x23d   :  { %s149_s1 = smul.f32 0.0625, %s168_s0 }
 0x23f   :  { %151 = sst [smem:[#allocation8]] %s149_s1 }
 0x240   :  { %159 = dma.smem_to_hbm %s242_s19, 16, %s278_s2, [#allocation5]  }
 0x241   :  { %237 = dma.done.wait [#allocation5], 16  }
 0x242   :  { %238 = vsyncadd [#allocation5], 4294967280 }
 0x243   :  { %163 = sfence }
 0x244   :  { %164 = vsyncpa [#allocation4], 1 }
 0x245   :  { %165 = vsyncpa [#allocation7], 1 }
 0x246   :  { %166 = vsyncpa [#allocation5], 1 }

</bundles_post_ra>
